<compile_context>
chip_gen: v6e
topology: v6e:2x2x1
jax: 0.10.0
libtpu: 0.0.40
codegen_flags: <defaults>
</compile_context>

<pallas_src>
import jax
import jax.numpy as jnp
from jax.experimental import pallas as pl
from jax.experimental.pallas import tpu as pltpu


def _elementwise_linear_kernel(w_ref, x_ref, o_ref):
    # w_ref: (1, TF) weights tile, broadcast over the (TM, TF) input tile.
    o_ref[...] = (x_ref[...] * w_ref[...]).astype(o_ref.dtype)


def _sublane_multiple(dtype) -> int:
    """Row-tile granularity that matches TPU sublane packing for the dtype."""
    itemsize = jnp.dtype(dtype).itemsize
    if itemsize >= 4:
        return 8
    if itemsize == 2:
        return 16
    return 32


def elementwise_linear(x, weights, *, tile_rows=512, tile_features=1024):
    """Compute weights * x with weights broadcast over the last dim of x."""
    orig_shape = x.shape
    F = orig_shape[-1]
    assert weights.shape == (F,), "weights must match last dim of input"

    x2d = x.reshape(-1, F)          # flatten leading dims to rows (view-level reshape)
    R = x2d.shape[0]
    w2d = weights.reshape(1, F)

    sub = _sublane_multiple(x.dtype)
    itemsize = jnp.dtype(x.dtype).itemsize

    # Feature tile: lane-dense (multiple of 128, unmasked vst) when possible, else full dim.
    if F % 128 == 0:
        TF = min(F, tile_features)
    else:
        TF = F  # full-dim blocks are always legal

    # Row tile: as large as possible while keeping each block <= ~2 MiB
    # (double-buffered x + out + weights stays well inside every generation's scoped VMEM).
    block_budget_bytes = 2 * 1024 * 1024
    rows_by_budget = max(sub, (block_budget_bytes // max(1, TF * itemsize)) // sub * sub)
    TM = max(sub, (min(tile_rows, rows_by_budget) // sub) * sub)
    if R <= TM:
        TM = R  # one full-dim row block; no padding / slicing needed

    n_r = pl.cdiv(R, TM)
    n_f = pl.cdiv(F, TF)

    out = pl.pallas_call(
        _elementwise_linear_kernel,
        out_shape=jax.ShapeDtypeStruct((R, F), x.dtype),
        grid_spec=pltpu.PrefetchScalarGridSpec(
            num_scalar_prefetch=0,
            grid=(n_r, n_f),
            in_specs=[
                pl.BlockSpec((1, TF), lambda i, j: (0, j)),    # tiny weight tile per feature block
                pl.BlockSpec((TM, TF), lambda i, j: (i, j)),   # input rows x features tile
            ],
            out_specs=pl.BlockSpec((TM, TF), lambda i, j: (i, j)),
        ),
        compiler_params=pltpu.CompilerParams(
            # rows independent -> parallel (megacore / dual-TC sharding); feature axis arbitrary.
            dimension_semantics=("parallel", "arbitrary"),
            vmem_limit_bytes=32 * 1024 * 1024,
        ),
    )(w2d, x2d)

    return out.reshape(orig_shape)


if __name__ == "__main__":
    key = jax.random.PRNGKey(0)
    k_x, k_w, k_x2, k_w2 = jax.random.split(key, 4)

    # Small shapes consistent with the module: batch=2, seq=16, features=128.
    B, S, F = 2, 16, 128
    x = jax.random.normal(k_x, (B, S, F), dtype=jnp.float32)

    # Module __init__ initializes weights to zeros (deterministic).
    weights_zero = jnp.zeros((F,), dtype=jnp.float32)
    out_zero = jax.block_until_ready(elementwise_linear(x, weights_zero))
    assert jnp.allclose(out_zero, jnp.zeros_like(x)), "zero-weight output mismatch"

    # Nonzero weights (same forward semantics as PyTorch broadcasting).
    weights_rand = jax.random.normal(k_w, (F,), dtype=jnp.float32)
    out_rand = jax.block_until_ready(elementwise_linear(x, weights_rand))
    ref = weights_rand * x
    assert jnp.allclose(out_rand, ref, atol=1e-6, rtol=1e-6), "nonzero-weight output mismatch"

    # Ragged row count (not a multiple of 8): exercises the no-pad, full-dim-block path.
    x_odd = jax.random.normal(k_x2, (3, 5, F), dtype=jnp.float32)
    out_odd = jax.block_until_ready(elementwise_linear(x_odd, weights_rand))
    assert jnp.allclose(out_odd, weights_rand * x_odd, atol=1e-6, rtol=1e-6), "ragged-rows mismatch"

    # bf16 path: exercises the dtype-aware sublane tile and explicit output astype.
    xb = jax.random.normal(k_x2, (2, 64, 256), dtype=jnp.float32).astype(jnp.bfloat16)
    wb = jax.random.normal(k_w2, (256,), dtype=jnp.float32).astype(jnp.bfloat16)
    out_b = jax.block_until_ready(elementwise_linear(xb, wb))
    ref_b = (wb * xb).astype(jnp.bfloat16)
    assert jnp.allclose(out_b.astype(jnp.float32), ref_b.astype(jnp.float32),
                        atol=1e-2, rtol=1e-2), "bf16 output mismatch"

    print("KERNEL_OK")
</pallas_src>

<mosaic_0001>
module attributes {stable_mosaic.version = 11 : i64} {
  func.func @_elementwise_linear_kernel(%arg0: i32, %arg1: i32, %arg2: memref<1x128xf32, #tpu.memory_space<vmem>>, %arg3: memref<32x128xf32, #tpu.memory_space<vmem>>, %arg4: memref<32x128xf32, #tpu.memory_space<vmem>>) attributes {dimension_semantics = [#tpu.dimension_semantics<parallel>, #tpu.dimension_semantics<arbitrary>], iteration_bounds = array<i64: 1, 1>, scalar_prefetch = 0 : i64, scratch_operands = 0 : i64, tpu.core_type = #tpu.core_type<tc>, window_params = [{transform_indices = @transform_0, window_bounds = array<i64: 1, 128>}, {transform_indices = @transform_1, window_bounds = array<i64: 32, 128>}, {transform_indices = @transform_2, window_bounds = array<i64: 32, 128>}]} {
    %c0 = arith.constant 0 : index
    %c0_0 = arith.constant 0 : index
    %0 = vector.load %arg3[%c0, %c0_0] : memref<32x128xf32, #tpu.memory_space<vmem>>, vector<32x128xf32>
    %c0_1 = arith.constant 0 : index
    %c0_2 = arith.constant 0 : index
    %1 = vector.load %arg2[%c0_1, %c0_2] : memref<1x128xf32, #tpu.memory_space<vmem>>, vector<1x128xf32>
    %2 = vector.broadcast %1 : vector<1x128xf32> to vector<32x128xf32>
    %3 = arith.mulf %0, %2 : vector<32x128xf32>
    %c0_3 = arith.constant 0 : index
    %c0_4 = arith.constant 0 : index
    %4 = vector.load %arg4[%c0_3, %c0_4] : memref<32x128xf32, #tpu.memory_space<vmem>>, vector<32x128xf32>
    tpu.vector_store %arg4[%c0_3, %c0_4], %3 {strides = array<i32>} : memref<32x128xf32, #tpu.memory_space<vmem>>, vector<32x128xf32>,
    return
  }
  func.func @transform_0(%arg0: i32, %arg1: i32) -> (i32, i32) {
    %c0_i32 = arith.constant 0 : i32
    %c0_i32_0 = arith.constant 0 : i32
    return %c0_i32, %arg1 : i32, i32
  }
  func.func @transform_1(%arg0: i32, %arg1: i32) -> (i32, i32) {
    %c0_i32 = arith.constant 0 : i32
    return %arg0, %arg1 : i32, i32
  }
  func.func @transform_2(%arg0: i32, %arg1: i32) -> (i32, i32) {
    %c0_i32 = arith.constant 0 : i32
    return %arg0, %arg1 : i32, i32
  }
}

</mosaic_0001>

<bundles_post_ra>
// kernel: tpu_custom_call.1
= control target key start
LH: loop header
LB: loop body
LE: loop exit
PB: predicated region body
PF: predicated region fallthrough
CT: control target
= control target key end

     0   :  { %7 = vsyncpa [#allocation3], 0  ;;  %s182_s0 = inlined_call_operand.hbm [shape: f32[1,128], index: 0, kind: input, shape index: {}]   ;;  %s183_s1 = inlined_call_operand.hbm [shape: f32[32,128], index: 1, kind: input, shape index: {}]   ;;  %s184_s2 = inlined_call_operand.hbm [shape: f32[32,128], index: 2, kind: output, shape index: {}]  }
   0x1   :  { %8 = vsyncpa [#allocation6], 0 }
   0x2   :  { %9 = vsyncpa [#allocation4], 0  ;;  %s147_s9 = smov [#allocation2]   ;;  %s148_s11 = smov [#allocation5]  }
   0x3   :  { %s16_s10 = sshll.u32 %s147_s9, 4  ;;  %s25_s12 = sshll.u32 %s148_s11, 4  ;;  %s17_s10 = int_to_ptr.vmem [resolvable:$true] %s16_s10  ;;  %s26_s12 = int_to_ptr.vmem [resolvable:$true] %s25_s12 }
   0x4   :  { %s89_s13 = scalar_lea.vmem %s17_s10, 16  ;;  %s93_s14 = scalar_lea.vmem %s17_s10, 32 }
   0x5   :  { %p90_p0 = scmp.ne.s32.totalorder %s17_s10, %s89_s13  ;;  %p94_p1 = scmp.lt.s32.totalorder %s17_s10, %s17_s10 }
   0x6   :  { %p95_p2 = scmp.lt.s32.totalorder %s93_s14, %s89_s13 }
   0x8   :  { %p96_p3 = por %p95_p2, %p94_p1 }
   0xa   :  { %p97_p4 = pnand %p96_p3, %p90_p0 }
   0xc   :  { %100 = shalt.err (!%p97_p4)
}
   0xd   :  { %19 = dma.hbm_to_vmem [thread:$0]  %s182_s0, 16, %s17_s10, [#allocation3]  }
   0xe   :  { %s109_s17 = scalar_lea.vmem %s26_s12, 512  ;;  %p114_p6 = scmp.lt.s32.totalorder %s26_s12, %s26_s12 }
   0xf   :  { %p110_p5 = scmp.ne.s32.totalorder %s26_s12, %s109_s17  ;;  %p115_p7 = scmp.lt.s32.totalorder %s109_s17, %s109_s17 }
  0x11   :  { %p116_p8 = por %p115_p7, %p114_p6 }
  0x13   :  { %p117_p9 = pnand %p116_p8, %p110_p5 }
  0x15   :  { %120 = shalt.err (!%p117_p9)
}
  0x16   :  { %s149_s18 = smov 128   ;;  %s150_s19 = smov 8  }
  0x17   :  { %31 = dma.hbm_to_vmem [thread:$0]  %s183_s1, 512, %s26_s12, [#allocation6], %s149_s18, %s149_s18, %s150_s19  }
  0x18   :  { %141 = dma.done.wait [#allocation3], 16  }
  0x19   :  { %142 = vsyncadd [#allocation3], 4294967280 }
  0x1a   :  { %143 = dma.done.wait [#allocation6], 512  }
  0x1b   :  { %144 = vsyncadd [#allocation6], 4294966784  ;;  %s151_s0 = smov [#allocation7]   ;;  %v38_v0 = vld [vmem:[#allocation5] sm:$0xff]  ;;  %v75_v1 = vld [vmem:[#allocation2] ss:$0 sm:$0xff] }
  0x1c   :  { %s62_s22 = sshll.u32 %s151_s0, 4  ;;  %v39_v2 = vld [vmem:[#allocation5 + $0x8] sm:$0xff]  ;;  %v49_v3 = vmul.f32 %v75_v1, %v38_v0  ;;  %v40_v5 = vld [vmem:[#allocation5 + $0x10] sm:$0xff]  ;;  %v41_v6 = vld [vmem:[#allocation5 + $0x18] sm:$0xff]  ;;  %s63_s22 = int_to_ptr.vmem [resolvable:$true] %s62_s22 }
  0x1d   :  { %v50_v4 = vmul.f32 %v75_v1, %v39_v2  ;;  %v51_v7 = vmul.f32 %v75_v1, %v40_v5  ;;  %v52_v8 = vmul.f32 %v75_v1, %v41_v6  ;;  %s121_s1 = scalar_lea.vmem %s63_s22, 512  ;;  %p126_p11 = scmp.lt.s32.totalorder %s63_s22, %s63_s22 }
  0x1e   :  { %53 = vst [vmem:[#allocation7] sm:$0xff] %v49_v3  ;;  %p122_p10 = scmp.ne.s32.totalorder %s63_s22, %s121_s1  ;;  %p127_p12 = scmp.lt.s32.totalorder %s121_s1, %s121_s1 }
  0x1f   :  { %54 = vst [vmem:[#allocation7 + $0x8] sm:$0xff] %v50_v4  ;;  %55 = vst [vmem:[#allocation7 + $0x10] sm:$0xff] %v51_v7 }
  0x20   :  { %56 = vst [vmem:[#allocation7 + $0x18] sm:$0xff] %v52_v8  ;;  %p128_p13 = por %p127_p12, %p126_p11 }
  0x22   :  { %p129_p0 = pnand %p128_p13, %p122_p10 }
  0x24   :  { %132 = shalt.err (!%p129_p0)
}
  0x25   :  { %68 = dma.vmem_to_hbm [thread:$0]  %s63_s22, 512, %s184_s2, [#allocation4], %s149_s18, %s149_s18, %s150_s19  }
  0x26   :  { %145 = dma.done.wait [#allocation4], 512  }
  0x27   :  { %146 = vsyncadd [#allocation4], 4294966784 }
  0x28   :  { %72 = vsyncpa [#allocation3], 1 }
  0x29   :  { %73 = vsyncpa [#allocation6], 1 }
  0x2a   :  { %74 = vsyncpa [#allocation4], 1 }

</bundles_post_ra>
